<compile_context>
chip_gen: v5e
topology: v5e:2x2
jax: 0.10.0
libtpu: 0.0.40
codegen_flags: <defaults>
</compile_context>

<pallas_src>
import math

import jax
import jax.numpy as jnp
from jax import lax
from jax.experimental import pallas as pl
from jax.experimental.pallas import tpu as pltpu


# ---------------------------------------------------------------------------
# Pallas kernel: fused ConvTranspose2d(k=s,stride=s) + folded-BN bias + ReLU,
# all levels, channel-concatenated, written directly in NCHW lane order.
# ---------------------------------------------------------------------------
def _roll_lanes(y, shift):
    """Forward roll along the lane axis with a *static* shift.
    result[..., i] = y[..., i - shift]  (lowered to two static slices + concat;
    pltpu.roll is the single-XLU-op alternative)."""
    n = y.shape[-1]
    shift = shift % n
    if shift == 0:
        return y
    return jnp.concatenate([y[:, n - shift:], y[:, :n - shift]], axis=-1)


def _make_deblock_kernel(couts, s, ws):
    """couts: per-level output channels; s: stride; ws = W*s (output row width)."""
    L = len(couts)
    s2 = s * s

    def kernel(*refs):
        x_refs = refs[0:L]            # per level: (cin_i, lanes)  s-dilated input
        w_refs = refs[L:2 * L]        # per level: (s*s, cout_i, cin_i)  BN folded
        b_refs = refs[2 * L:3 * L]    # per level: (cout_i, 1)           BN folded
        o_ref = refs[3 * L]           # (cout_total, lanes), lanes == NCHW minor order

        row = 0
        for lvl in range(L):
            x = x_refs[lvl][...]                                   # (cin_i, lanes)
            acc = None
            for kk in range(s2):
                # (cout_i, cin_i) @ (cin_i, lanes): values land on the (0,0)
                # dilation slots, all other lanes are exactly zero.
                y = jnp.dot(w_refs[lvl][kk], x,
                            preferred_element_type=jnp.float32)
                shift = (kk // s) * ws + (kk % s)                  # (kh, kw) offset
                y = _roll_lanes(y, shift)
                acc = y if acc is None else acc + y
            acc = acc + b_refs[lvl][...]                           # bias once/lane
            o_ref[row:row + couts[lvl], :] = jnp.maximum(acc, 0.0).astype(o_ref.dtype)
            row += couts[lvl]

    return kernel


# ---------------------------------------------------------------------------
# Wrapper helpers
# ---------------------------------------------------------------------------
def _dilate_hw(x, s):
    """Insert s-1 zeros after every element along H and W (ConvTranspose grid)."""
    if s == 1:
        return x
    zero = jnp.array(0, x.dtype)
    cfg = [(0, 0, 0), (0, 0, 0), (0, s - 1, s - 1), (0, s - 1, s - 1)]
    return lax.pad(x, zero, cfg)


def _choose_row_block(H, unit, N, target_lanes=16384):
    """Pick rows-per-block so block lanes (= th*unit) are a multiple of 128 (or the
    full extent), th divides H, ~target_lanes per block, and the grid keeps >=2
    steps whenever possible (v7x megacore)."""
    g = 128 // math.gcd(128, unit)
    cands = [d for d in range(g, H + 1, g) if H % d == 0]
    cands.append(H)  # full extent is always a legal block dim
    want = max(1, target_lanes // unit)
    best, best_key = H, None
    for th in sorted(set(cands)):
        steps = N * (H // th)
        key = (0 if steps >= 2 else 1, abs(th - want))
        if best_key is None or key < best_key:
            best, best_key = th, key
    return best


def fused_deblocks_apply(xs, preps):
    """All xs share (N, H, W); all preps share stride s.
    Returns the channel-concatenated NCHW output (N, sum(Cout_i), H*s, W*s)."""
    L = len(xs)
    N, _, H, W = xs[0].shape
    s = int(preps[0]['stride'])
    for x, p in zip(xs, preps):
        assert x.shape[0] == N and x.shape[2] == H and x.shape[3] == W
        assert int(p['stride']) == s and s >= 1
        # TODO(synk): stride < 1 branch (strided Conv2d) not exercised by this config.

    cins = [int(x.shape[1]) for x in xs]
    couts = [int(p['cout']) for p in preps]
    cout_total = sum(couts)
    out_dtype = xs[0].dtype

    unit = s * s * W                    # output lanes produced per input row
    ws = W * s
    th = _choose_row_block(H, unit, N)
    lanes = th * unit
    grid = (N, H // th)

    # s-dilated inputs, flattened so the lane axis is already NCHW-minor order.
    xds = [_dilate_hw(x, s).reshape(N, cin, H * unit) for x, cin in zip(xs, cins)]

    in_specs = []
    for cin in cins:
        in_specs.append(pl.BlockSpec((None, cin, lanes), lambda n, h: (n, 0, h)))
    for p in preps:
        in_specs.append(pl.BlockSpec(p['wk'].shape, lambda n, h: (0, 0, 0)))
    for p in preps:
        in_specs.append(pl.BlockSpec(p['b'].shape, lambda n, h: (0, 0)))
    out_specs = pl.BlockSpec((None, cout_total, lanes), lambda n, h: (n, 0, h))

    # scoped-VMEM: double-buffered in/out blocks + resident weights/biases (+ slack)
    block_bytes = 4 * lanes * (sum(cins) + cout_total)
    const_bytes = 4 * sum(s * s * co * ci + co for co, ci in zip(couts, cins))
    vmem_limit = int(min(100 * 2 ** 20,
                         max(4 * 2 ** 20, 2 * (2 * block_bytes + 2 * const_bytes))))

    out = pl.pallas_call(
        _make_deblock_kernel(tuple(couts), s, ws),
        grid=grid,
        in_specs=in_specs,
        out_specs=out_specs,
        out_shape=jax.ShapeDtypeStruct((N, cout_total, H * unit), out_dtype),
        compiler_params=pltpu.CompilerParams(
            dimension_semantics=("parallel", "parallel"),
            vmem_limit_bytes=vmem_limit,
        ),
    )(*xds, *[p['wk'] for p in preps], *[p['b'] for p in preps])

    # (N, Cout_total, H*s*W*s) -> (N, Cout_total, H*s, W*s): free reshape, no transpose.
    return out.reshape(N, cout_total, H * s, W * s)


# ---------------------------------------------------------------------------
# Pure-JAX reference (from the ConvTranspose2d definition) — tests only
# ---------------------------------------------------------------------------
def _deblock_reference(x, p, eps=1e-3):
    w = p['weight']
    s = int(p['stride'])
    N, _, H, W = x.shape
    Cout = w.shape[1]
    y = jnp.einsum('nihw,iokl->nohkwl', x, w,
                   precision=jax.lax.Precision.HIGHEST).reshape(N, Cout, H * s, W * s)
    scale = p['gamma'] / jnp.sqrt(p['running_var'] + eps)
    bias = p['beta'] - p['running_mean'] * scale
    y = y * scale[None, :, None, None] + bias[None, :, None, None]
    return jnp.maximum(y, 0.0)


# ---------------------------------------------------------------------------
# BaseBEVDecoder in JAX (forward-pass semantics of the PyTorch module)
# ---------------------------------------------------------------------------
class BaseBEVDecoderPallas:
    def __init__(self, model_cfg, input_channels, key, eps=1e-3):
        self.model_cfg = model_cfg
        num_filters = model_cfg.get('NUM_FILTERS') or []
        self.num_levels = len(num_filters)
        num_upsample_filters = model_cfg.get('NUM_UPSAMPLE_FILTERS') or []
        upsample_strides = model_cfg.get('UPSAMPLE_STRIDES') or []
        if upsample_strides:
            assert len(upsample_strides) == len(num_upsample_filters)

        self.deblocks = []   # raw params (reference path)
        self._prep = []      # BN-folded kernel operands, built once (eval constants)
        for idx in range(self.num_levels):
            if len(upsample_strides) > 0:
                stride = int(upsample_strides[idx])
                # TODO(synk): stride < 1 branch (strided Conv2d) not exercised by this config.
                assert stride >= 1
                cin, cout = int(num_filters[idx]), int(num_upsample_filters[idx])
                key, k1, k2, k3, k4, k5 = jax.random.split(key, 6)
                raw = dict(
                    weight=0.1 * jax.random.normal(k1, (cin, cout, stride, stride), jnp.float32),
                    gamma=1.0 + 0.1 * jax.random.normal(k2, (cout,), jnp.float32),
                    beta=0.1 * jax.random.normal(k3, (cout,), jnp.float32),
                    running_mean=0.1 * jax.random.normal(k4, (cout,), jnp.float32),
                    running_var=0.5 + jnp.abs(jax.random.normal(k5, (cout,), jnp.float32)),
                    stride=stride,
                )
                self.deblocks.append(raw)
                # fold BN (eval) into the ConvTranspose weights/bias once
                scale = raw['gamma'] / jnp.sqrt(raw['running_var'] + eps)     # (cout,)
                bias = raw['beta'] - raw['running_mean'] * scale              # (cout,)
                wk = jnp.transpose(raw['weight'] * scale[None, :, None, None],
                                   (2, 3, 1, 0)).reshape(stride * stride, cout, cin)
                self._prep.append(dict(
                    wk=wk.astype(jnp.float32),
                    b=bias.reshape(cout, 1).astype(jnp.float32),
                    stride=stride, cout=cout, cin=cin,
                ))
        self.num_bev_features = sum(num_upsample_filters)
        # TODO(synk): the `len(self.deblocks) > len(self.blocks)` branch in the PyTorch
        # forward references self.blocks, undefined on the base class; never taken here.

    @staticmethod
    def _can_fuse(xs, preps):
        if not xs:
            return False
        n, _, h, w = xs[0].shape
        s = int(preps[0]['stride'])
        return all(x.shape[0] == n and x.shape[2] == h and x.shape[3] == w for x in xs) \
            and all(int(p['stride']) == s for p in preps)

    def forward(self, data_dict):
        spatial_features = data_dict['spatial_features']
        xs = []
        x = spatial_features
        for _ in range(self.num_levels):
            stride = int(spatial_features.shape[2] // x.shape[2])
            x = data_dict['spatial_features_%dx' % stride]
            xs.append(x)

        if not xs:
            out = spatial_features
        elif len(self.deblocks) > 0:
            if self._can_fuse(xs, self._prep):
                # single fused pallas_call: all levels + channel concat, NCHW out
                out = fused_deblocks_apply(xs, self._prep)
            else:
                ups = [fused_deblocks_apply([xi], [pi])
                       for xi, pi in zip(xs, self._prep)]
                out = jnp.concatenate(ups, axis=1) if len(ups) > 1 else ups[0]
        else:
            out = jnp.concatenate(xs, axis=1) if len(xs) > 1 else xs[0]

        data_dict['spatial_features_2d'] = out
        return data_dict

    # reference forward (pure JAX) — for testing only, not on the hot path
    def reference_forward(self, data_dict):
        spatial_features = data_dict['spatial_features']
        ups = []
        x = spatial_features
        for i in range(self.num_levels):
            stride = int(spatial_features.shape[2] // x.shape[2])
            x = data_dict['spatial_features_%dx' % stride]
            if len(self.deblocks) > 0:
                ups.append(_deblock_reference(x, self.deblocks[i]))
            else:
                ups.append(x)
        if len(ups) > 1:
            return jnp.concatenate(ups, axis=1)
        elif len(ups) == 1:
            return ups[0]
        return spatial_features


if __name__ == "__main__":
    key = jax.random.PRNGKey(0)
    key, kp, k0, k1, k2 = jax.random.split(key, 5)

    model_cfg = {
        'NUM_FILTERS': [4, 8],
        'UPSAMPLE_STRIDES': [2, 2],
        'NUM_UPSAMPLE_FILTERS': [8, 8],
    }
    decoder = BaseBEVDecoderPallas(model_cfg, input_channels=4, key=kp)

    # Shapes chosen so the forward's stride-walk is self-consistent:
    #   level 0: stride=1 -> 'spatial_features_1x' (2, 4, 8, 8) -> ConvT s=2 -> (2, 8, 16, 16)
    #   level 1: stride=2 -> 'spatial_features_2x' (2, 8, 8, 8) -> ConvT s=2 -> (2, 8, 16, 16)
    data_dict = {
        'spatial_features':    jax.random.normal(k0, (2, 4, 16, 16), jnp.float32),
        'spatial_features_1x': jax.random.normal(k1, (2, 4, 8, 8), jnp.float32),
        'spatial_features_2x': jax.random.normal(k2, (2, 8, 8, 8), jnp.float32),
    }

    out = decoder.forward(dict(data_dict))
    result = jax.block_until_ready(out['spatial_features_2d'])
    assert result.shape == (2, decoder.num_bev_features, 16, 16), result.shape

    # one-shot correctness check, outside the forward hot path
    ref = jax.block_until_ready(decoder.reference_forward(data_dict))
    assert jnp.allclose(result, ref, atol=1e-3, rtol=1e-3), \
        float(jnp.max(jnp.abs(result - ref)))

    print("KERNEL_OK")
</pallas_src>

<mosaic_0001>
module attributes {stable_mosaic.version = 11 : i64} {
  func.func @kernel(%arg0: i32, %arg1: i32, %arg2: memref<1x4x256xf32, #tpu.memory_space<vmem>>, %arg3: memref<1x8x256xf32, #tpu.memory_space<vmem>>, %arg4: memref<4x8x4xf32, #tpu.memory_space<vmem>>, %arg5: memref<4x8x8xf32, #tpu.memory_space<vmem>>, %arg6: memref<8x1xf32, #tpu.memory_space<vmem>>, %arg7: memref<8x1xf32, #tpu.memory_space<vmem>>, %arg8: memref<1x16x256xf32, #tpu.memory_space<vmem>>) attributes {dimension_semantics = [#tpu.dimension_semantics<parallel>, #tpu.dimension_semantics<parallel>], iteration_bounds = array<i64: 2, 1>, scalar_prefetch = 0 : i64, scratch_operands = 0 : i64, tpu.core_type = #tpu.core_type<tc>, window_params = [{transform_indices = @transform_0, window_bounds = array<i64: 1, 4, 256>}, {transform_indices = @transform_1, window_bounds = array<i64: 1, 8, 256>}, {pipeline_mode = #tpu.pipeline_mode<synchronous>, transform_indices = @transform_2, window_bounds = array<i64: 4, 8, 4>}, {pipeline_mode = #tpu.pipeline_mode<synchronous>, transform_indices = @transform_3, window_bounds = array<i64: 4, 8, 8>}, {pipeline_mode = #tpu.pipeline_mode<synchronous>, transform_indices = @transform_4, window_bounds = array<i64: 8, 1>}, {pipeline_mode = #tpu.pipeline_mode<synchronous>, transform_indices = @transform_5, window_bounds = array<i64: 8, 1>}, {transform_indices = @transform_6, window_bounds = array<i64: 1, 16, 256>}]} {
    %c0 = arith.constant 0 : index
    %c0_0 = arith.constant 0 : index
    %c0_1 = arith.constant 0 : index
    %0 = vector.load %arg2[%c0, %c0_0, %c0_1] : memref<1x4x256xf32, #tpu.memory_space<vmem>>, vector<1x4x256xf32>
    %1 = vector.shape_cast %0 : vector<1x4x256xf32> to vector<4x256xf32>
    %c0_2 = arith.constant 0 : index
    %c0_3 = arith.constant 0 : index
    %c0_4 = arith.constant 0 : index
    %2 = vector.load %arg4[%c0_2, %c0_3, %c0_4] : memref<4x8x4xf32, #tpu.memory_space<vmem>>, vector<1x8x4xf32>
    %3 = vector.shape_cast %2 : vector<1x8x4xf32> to vector<8x4xf32>
    %cst = arith.constant dense<0.000000e+00> : vector<8x256xf32>
    %4 = tpu.matmul %3, %1, %cst {dimension_numbers = #tpu.dot_dimension_numbers<[1], [0], [0], [1], [0, 0, 1, 1], [], []>} : vector<8x4xf32>, vector<4x256xf32>, vector<8x256xf32> -> vector<8x256xf32>
    %c1 = arith.constant 1 : index
    %c0_5 = arith.constant 0 : index
    %c0_6 = arith.constant 0 : index
    %5 = vector.load %arg4[%c1, %c0_5, %c0_6] : memref<4x8x4xf32, #tpu.memory_space<vmem>>, vector<1x8x4xf32>
    %6 = vector.shape_cast %5 : vector<1x8x4xf32> to vector<8x4xf32>
    %cst_7 = arith.constant dense<0.000000e+00> : vector<8x256xf32>
    %7 = tpu.matmul %6, %1, %cst_7 {dimension_numbers = #tpu.dot_dimension_numbers<[1], [0], [0], [1], [0, 0, 1, 1], [], []>} : vector<8x4xf32>, vector<4x256xf32>, vector<8x256xf32> -> vector<8x256xf32>
    %8 = vector.extract_strided_slice %7 {offsets = [0, 255], sizes = [8, 1], strides = [1, 1]} : vector<8x256xf32> to vector<8x1xf32>
    %9 = vector.extract_strided_slice %7 {offsets = [0, 0], sizes = [8, 255], strides = [1, 1]} : vector<8x256xf32> to vector<8x255xf32>
    %10 = tpu.concatenate %8, %9 in 1 : vector<8x1xf32>, vector<8x255xf32> -> vector<8x256xf32>
    %11 = arith.addf %4, %10 : vector<8x256xf32>
    %c2 = arith.constant 2 : index
    %c0_8 = arith.constant 0 : index
    %c0_9 = arith.constant 0 : index
    %12 = vector.load %arg4[%c2, %c0_8, %c0_9] : memref<4x8x4xf32, #tpu.memory_space<vmem>>, vector<1x8x4xf32>
    %13 = vector.shape_cast %12 : vector<1x8x4xf32> to vector<8x4xf32>
    %cst_10 = arith.constant dense<0.000000e+00> : vector<8x256xf32>
    %14 = tpu.matmul %13, %1, %cst_10 {dimension_numbers = #tpu.dot_dimension_numbers<[1], [0], [0], [1], [0, 0, 1, 1], [], []>} : vector<8x4xf32>, vector<4x256xf32>, vector<8x256xf32> -> vector<8x256xf32>
    %15 = vector.extract_strided_slice %14 {offsets = [0, 240], sizes = [8, 16], strides = [1, 1]} : vector<8x256xf32> to vector<8x16xf32>
    %16 = vector.extract_strided_slice %14 {offsets = [0, 0], sizes = [8, 240], strides = [1, 1]} : vector<8x256xf32> to vector<8x240xf32>
    %17 = tpu.concatenate %15, %16 in 1 : vector<8x16xf32>, vector<8x240xf32> -> vector<8x256xf32>
    %18 = arith.addf %11, %17 : vector<8x256xf32>
    %c3 = arith.constant 3 : index
    %c0_11 = arith.constant 0 : index
    %c0_12 = arith.constant 0 : index
    %19 = vector.load %arg4[%c3, %c0_11, %c0_12] : memref<4x8x4xf32, #tpu.memory_space<vmem>>, vector<1x8x4xf32>
    %20 = vector.shape_cast %19 : vector<1x8x4xf32> to vector<8x4xf32>
    %cst_13 = arith.constant dense<0.000000e+00> : vector<8x256xf32>
    %21 = tpu.matmul %20, %1, %cst_13 {dimension_numbers = #tpu.dot_dimension_numbers<[1], [0], [0], [1], [0, 0, 1, 1], [], []>} : vector<8x4xf32>, vector<4x256xf32>, vector<8x256xf32> -> vector<8x256xf32>
    %22 = vector.extract_strided_slice %21 {offsets = [0, 239], sizes = [8, 17], strides = [1, 1]} : vector<8x256xf32> to vector<8x17xf32>
    %23 = vector.extract_strided_slice %21 {offsets = [0, 0], sizes = [8, 239], strides = [1, 1]} : vector<8x256xf32> to vector<8x239xf32>
    %24 = tpu.concatenate %22, %23 in 1 : vector<8x17xf32>, vector<8x239xf32> -> vector<8x256xf32>
    %25 = arith.addf %18, %24 : vector<8x256xf32>
    %c0_14 = arith.constant 0 : index
    %c0_15 = arith.constant 0 : index
    %26 = vector.load %arg6[%c0_14, %c0_15] : memref<8x1xf32, #tpu.memory_space<vmem>>, vector<8x1xf32>
    %27 = vector.broadcast %26 : vector<8x1xf32> to vector<8x256xf32>
    %28 = arith.addf %25, %27 : vector<8x256xf32>
    %cst_16 = arith.constant 0.000000e+00 : f32
    %29 = vector.broadcast %cst_16 : f32 to vector<8x256xf32>
    %30 = arith.maximumf %28, %29 : vector<8x256xf32>
    %c0_17 = arith.constant 0 : index
    %c0_18 = arith.constant 0 : index
    %c0_19 = arith.constant 0 : index
    %31 = vector.load %arg8[%c0_17, %c0_18, %c0_19] : memref<1x16x256xf32, #tpu.memory_space<vmem>>, vector<1x8x256xf32>
    %32 = vector.shape_cast %31 : vector<1x8x256xf32> to vector<8x256xf32>
    %33 = vector.shape_cast %30 : vector<8x256xf32> to vector<1x8x256xf32>
    tpu.vector_store %arg8[%c0_17, %c0_18, %c0_19], %33 {strides = array<i32>} : memref<1x16x256xf32, #tpu.memory_space<vmem>>, vector<1x8x256xf32>,
    %c0_20 = arith.constant 0 : index
    %c0_21 = arith.constant 0 : index
    %c0_22 = arith.constant 0 : index
    %34 = vector.load %arg3[%c0_20, %c0_21, %c0_22] : memref<1x8x256xf32, #tpu.memory_space<vmem>>, vector<1x8x256xf32>
    %35 = vector.shape_cast %34 : vector<1x8x256xf32> to vector<8x256xf32>
    %c0_23 = arith.constant 0 : index
    %c0_24 = arith.constant 0 : index
    %c0_25 = arith.constant 0 : index
    %36 = vector.load %arg5[%c0_23, %c0_24, %c0_25] : memref<4x8x8xf32, #tpu.memory_space<vmem>>, vector<1x8x8xf32>
    %37 = vector.shape_cast %36 : vector<1x8x8xf32> to vector<8x8xf32>
    %cst_26 = arith.constant dense<0.000000e+00> : vector<8x256xf32>
    %38 = tpu.matmul %37, %35, %cst_26 {dimension_numbers = #tpu.dot_dimension_numbers<[1], [0], [0], [1], [0, 0, 1, 1], [], []>} : vector<8x8xf32>, vector<8x256xf32>, vector<8x256xf32> -> vector<8x256xf32>
    %c1_27 = arith.constant 1 : index
    %c0_28 = arith.constant 0 : index
    %c0_29 = arith.constant 0 : index
    %39 = vector.load %arg5[%c1_27, %c0_28, %c0_29] : memref<4x8x8xf32, #tpu.memory_space<vmem>>, vector<1x8x8xf32>
    %40 = vector.shape_cast %39 : vector<1x8x8xf32> to vector<8x8xf32>
    %cst_30 = arith.constant dense<0.000000e+00> : vector<8x256xf32>
    %41 = tpu.matmul %40, %35, %cst_30 {dimension_numbers = #tpu.dot_dimension_numbers<[1], [0], [0], [1], [0, 0, 1, 1], [], []>} : vector<8x8xf32>, vector<8x256xf32>, vector<8x256xf32> -> vector<8x256xf32>
    %42 = vector.extract_strided_slice %41 {offsets = [0, 255], sizes = [8, 1], strides = [1, 1]} : vector<8x256xf32> to vector<8x1xf32>
    %43 = vector.extract_strided_slice %41 {offsets = [0, 0], sizes = [8, 255], strides = [1, 1]} : vector<8x256xf32> to vector<8x255xf32>
    %44 = tpu.concatenate %42, %43 in 1 : vector<8x1xf32>, vector<8x255xf32> -> vector<8x256xf32>
    %45 = arith.addf %38, %44 : vector<8x256xf32>
    %c2_31 = arith.constant 2 : index
    %c0_32 = arith.constant 0 : index
    %c0_33 = arith.constant 0 : index
    %46 = vector.load %arg5[%c2_31, %c0_32, %c0_33] : memref<4x8x8xf32, #tpu.memory_space<vmem>>, vector<1x8x8xf32>
    %47 = vector.shape_cast %46 : vector<1x8x8xf32> to vector<8x8xf32>
    %cst_34 = arith.constant dense<0.000000e+00> : vector<8x256xf32>
    %48 = tpu.matmul %47, %35, %cst_34 {dimension_numbers = #tpu.dot_dimension_numbers<[1], [0], [0], [1], [0, 0, 1, 1], [], []>} : vector<8x8xf32>, vector<8x256xf32>, vector<8x256xf32> -> vector<8x256xf32>
    %49 = vector.extract_strided_slice %48 {offsets = [0, 240], sizes = [8, 16], strides = [1, 1]} : vector<8x256xf32> to vector<8x16xf32>
    %50 = vector.extract_strided_slice %48 {offsets = [0, 0], sizes = [8, 240], strides = [1, 1]} : vector<8x256xf32> to vector<8x240xf32>
    %51 = tpu.concatenate %49, %50 in 1 : vector<8x16xf32>, vector<8x240xf32> -> vector<8x256xf32>
    %52 = arith.addf %45, %51 : vector<8x256xf32>
    %c3_35 = arith.constant 3 : index
    %c0_36 = arith.constant 0 : index
    %c0_37 = arith.constant 0 : index
    %53 = vector.load %arg5[%c3_35, %c0_36, %c0_37] : memref<4x8x8xf32, #tpu.memory_space<vmem>>, vector<1x8x8xf32>
    %54 = vector.shape_cast %53 : vector<1x8x8xf32> to vector<8x8xf32>
    %cst_38 = arith.constant dense<0.000000e+00> : vector<8x256xf32>
    %55 = tpu.matmul %54, %35, %cst_38 {dimension_numbers = #tpu.dot_dimension_numbers<[1], [0], [0], [1], [0, 0, 1, 1], [], []>} : vector<8x8xf32>, vector<8x256xf32>, vector<8x256xf32> -> vector<8x256xf32>
    %56 = vector.extract_strided_slice %55 {offsets = [0, 239], sizes = [8, 17], strides = [1, 1]} : vector<8x256xf32> to vector<8x17xf32>
    %57 = vector.extract_strided_slice %55 {offsets = [0, 0], sizes = [8, 239], strides = [1, 1]} : vector<8x256xf32> to vector<8x239xf32>
    %58 = tpu.concatenate %56, %57 in 1 : vector<8x17xf32>, vector<8x239xf32> -> vector<8x256xf32>
    %59 = arith.addf %52, %58 : vector<8x256xf32>
    %c0_39 = arith.constant 0 : index
    %c0_40 = arith.constant 0 : index
    %60 = vector.load %arg7[%c0_39, %c0_40] : memref<8x1xf32, #tpu.memory_space<vmem>>, vector<8x1xf32>
    %61 = vector.broadcast %60 : vector<8x1xf32> to vector<8x256xf32>
    %62 = arith.addf %59, %61 : vector<8x256xf32>
    %cst_41 = arith.constant 0.000000e+00 : f32
    %63 = vector.broadcast %cst_41 : f32 to vector<8x256xf32>
    %64 = arith.maximumf %62, %63 : vector<8x256xf32>
    %c0_42 = arith.constant 0 : index
    %c8 = arith.constant 8 : index
    %c0_43 = arith.constant 0 : index
    %65 = vector.load %arg8[%c0_42, %c8, %c0_43] : memref<1x16x256xf32, #tpu.memory_space<vmem>>, vector<1x8x256xf32>
    %66 = vector.shape_cast %65 : vector<1x8x256xf32> to vector<8x256xf32>
    %67 = vector.shape_cast %64 : vector<8x256xf32> to vector<1x8x256xf32>
    tpu.vector_store %arg8[%c0_42, %c8, %c0_43], %67 {strides = array<i32>} : memref<1x16x256xf32, #tpu.memory_space<vmem>>, vector<1x8x256xf32>,
    return
  }
  func.func @transform_0(%arg0: i32, %arg1: i32) -> (i32, i32, i32) {
    %c0_i32 = arith.constant 0 : i32
    %c0_i32_0 = arith.constant 0 : i32
    return %arg0, %c0_i32, %arg1 : i32, i32, i32
  }
  func.func @transform_1(%arg0: i32, %arg1: i32) -> (i32, i32, i32) {
    %c0_i32 = arith.constant 0 : i32
    %c0_i32_0 = arith.constant 0 : i32
    return %arg0, %c0_i32, %arg1 : i32, i32, i32
  }
  func.func @transform_2(%arg0: i32, %arg1: i32) -> (i32, i32, i32) {
    %c0_i32 = arith.constant 0 : i32
    %c0_i32_0 = arith.constant 0 : i32
    %c0_i32_1 = arith.constant 0 : i32
    %c0_i32_2 = arith.constant 0 : i32
    return %c0_i32, %c0_i32_0, %c0_i32_1 : i32, i32, i32
  }
  func.func @transform_3(%arg0: i32, %arg1: i32) -> (i32, i32, i32) {
    %c0_i32 = arith.constant 0 : i32
    %c0_i32_0 = arith.constant 0 : i32
    %c0_i32_1 = arith.constant 0 : i32
    %c0_i32_2 = arith.constant 0 : i32
    return %c0_i32, %c0_i32_0, %c0_i32_1 : i32, i32, i32
  }
  func.func @transform_4(%arg0: i32, %arg1: i32) -> (i32, i32) {
    %c0_i32 = arith.constant 0 : i32
    %c0_i32_0 = arith.constant 0 : i32
    %c0_i32_1 = arith.constant 0 : i32
    return %c0_i32, %c0_i32_0 : i32, i32
  }
  func.func @transform_5(%arg0: i32, %arg1: i32) -> (i32, i32) {
    %c0_i32 = arith.constant 0 : i32
    %c0_i32_0 = arith.constant 0 : i32
    %c0_i32_1 = arith.constant 0 : i32
    return %c0_i32, %c0_i32_0 : i32, i32
  }
  func.func @transform_6(%arg0: i32, %arg1: i32) -> (i32, i32, i32) {
    %c0_i32 = arith.constant 0 : i32
    %c0_i32_0 = arith.constant 0 : i32
    return %arg0, %c0_i32, %arg1 : i32, i32, i32
  }
}

</mosaic_0001>

<bundles_post_ra>
// kernel: tpu_custom_call.1
= control target key start
LH: loop header
LB: loop body
LE: loop exit
PB: predicated region body
PF: predicated region fallthrough
CT: control target
= control target key end

     0   :  { %11 = vsyncpa [#allocation3], 0  ;;  %s1400_s0 = inlined_call_operand.vmem [shape: f32[2,4,256], index: 0, kind: input, shape index: {}]   ;;  %s1401_s1 = inlined_call_operand.vmem [shape: f32[2,8,256], index: 1, kind: input, shape index: {}]   ;;  %s1402_s2 = inlined_call_operand.vmem [shape: f32[4,8,4], index: 2, kind: input, shape index: {}]   ;;  %s1403_s3 = inlined_call_operand.hbm [shape: f32[4,8,8], index: 3, kind: input, shape index: {}]   ;;  %s1404_s4 = inlined_call_operand.vmem [shape: f32[8,1], index: 4, kind: input, shape index: {}]   ;;  %s1405_s5 = inlined_call_operand.vmem [shape: f32[8,1], index: 5, kind: input, shape index: {}]   ;;  %s1406_s6 = inlined_call_operand.hbm [shape: f32[2,16,256], index: 6, kind: output, shape index: {}]  }
   0x1   :  { %12 = vsyncpa [#allocation4], 0 }
   0x2   :  { %14 = vsyncpa [#allocation4 + $0x1], 0  ;;  %s1234_s21 = smov 0   ;;  %s1236_s22 = smov 0  }
   0x3   :  { %s1238_s23 = smov 0   ;;  %s1240_s24 = smov 0  }
   0x4   :  { %s1242_s25 = smov 0   ;;  %s1244_s26 = smov 0  }
   0x5 LB: > { %s955_s27 = sadd.s32 4294967295, %s1189_s26   ;;  %s956_s28 = sadd.s32 4294967294, %s1189_s26   ;;  %s1189_s26 = sphi %s1244_s26, %s20_s26   ;;  %s1185_s25 = sphi %s1242_s25, %s1413_s25   ;;  %s1181_s24 = sphi %s1240_s24, %s1412_s24   ;;  %s1177_s23 = sphi %s1238_s23, %s1411_s23   ;;  %s1173_s22 = sphi %s1236_s22, %s1410_s22   ;;  %s1169_s21 = sphi %s1234_s21, %s1409_s21  }
   0x6   : > { %s32_s29 = sadd.s32 1, %s1185_s25  ;;  %s181_s30 = sadd.s32 1, %s1177_s23 }
   0x7   : > { %p34_p0 = scmp.ge.s32.totalorder %s32_s29, 2  ;;  %p191_p1 = scmp.ne.s32.totalorder %s1177_s23, %s1173_s22 }
   0x8   : > { %p192_p2 = scmp.eq.s32.totalorder %s955_s27, 1  ;;  %p197_p3 = scmp.ne.s32.totalorder %s1173_s22, %s1169_s21 }
   0x9   : > { %s1415_s29 = smov (%p34_p0, %s32_s29), 0  ;;  %p198_p5 = scmp.eq.s32.totalorder %s956_s28, 1 }
   0xa   : > { %p1274_p4 = por %p192_p2, %p191_p1  ;;  %s176_s8 = ssub.s32 %s1185_s25, %s1415_s29 }
   0xb   : > { %p957_p6 = scmp.ge.s32.totalorder %s1189_s26, 1  ;;  %p179_p7 = scmp.eq.s32.totalorder %s176_s8, 0 }
   0xc   : > { %p1281_p8 = por %p198_p5, %p197_p3  ;;  %p205_p9 = scmp.lt.s32.totalorder %s1189_s26, 3 }
   0xd   : > { %s1287_s10 = scalar_select %p179_p7, %s1177_s23, %s181_s30  }
   0xe   : > { %p206_p10 = pnand %p957_p6, %p205_p9  ;;  %p1016_p11 = scmp.eq.s32.totalorder %s955_s27, 0 }
   0xf   : > { %s219_s13 = sshll.u32 %s1403_s3, 4  ;;  %s1191_s14 = smov [#allocation2]   ;;  %s220_s13 = int_to_ptr.hbm [resolvable:$true] %s219_s13 }
  0x10   : > { %p1008_p12 = pneg %p206_p10  ;;  %s221_s15 = sshll.u32 %s1191_s14, 4  ;;  %s222_s15 = int_to_ptr.vmem [resolvable:$true] %s221_s15 }
  0x11   : > { %s1192_s16 = smov 128   ;;  %s1193_s17 = smov 8  }
  0x12   : > { %p1009_p13 = pnand %p1016_p11, %p1008_p12  ;;  %269 = sbr.rel (%p206_p10) target bundleno = 346 (0x15a), region = 44 }
  0x14   : > { %1011 = dma.hbm_to_vmem [thread:$0]  (!%p1009_p13), %s220_s13, 512, %s222_s15, [#allocation3], %s1192_s16, %s1192_s16, %s1193_s17  }
  0x17   : > { %1160 = dma.done.wait (%p1016_p11), [#allocation3], 512  }
  0x18   : > { %1162 = vsyncadd (%p1016_p11), [#allocation3], 4294966784  ;;  %p314_p0 = scmp.lt.s32.totalorder %s1181_s24, 1  ;;  %vm346_vm0 = vcmask 1043456   ;;  %v967_v1 = vld [vmem:[%s1402_s2 + $0x8] sm:$0xff]  ;;  %vm342_vm1 = vcmask 31744  }
  0x19   : > { %v335_v4 = vld [vmem:[%s1402_s2] sm:$0xff]  ;;  %v976_v7 = vld [vmem:[%s1402_s2 + $0x10] sm:$0xff]  ;;  %v981_v12 = vld [vmem:[%s1402_s2 + $0x18] sm:$0xff]  ;;  %vm602_vm2 = vcmask 64512   ;;  %s1194_s27 = smov 1   ;;  %v1195_v21 = vmov 0  }
  0x1a   : > { %s315_s18 = scalar_select %p314_p0, %s1181_s24, 1  ;;  %v601_v13 = vld [vmem:[#allocation2 + $0x8] sm:$0xff]  ;;  %v701_v16 = vld [vmem:[#allocation2 + $0x10] sm:$0xff]  ;;  %v599_v17 = vld [vmem:[#allocation2] sm:$0xff]  ;;  %1075 = vset.pattern.permute.xlu0 %v1195_v21  ;;  %1076 = vset.pattern.permute.xlu1 %v1195_v21  ;;  %vm398_vm3 = vcmask 7168   ;;  %vm512_vm4 = vcmask 130048  }
  0x1b   : > { %v759_v18 = vld [vmem:[#allocation2 + $0x18] sm:$0xff]  ;;  %s1197_s30 = smov 17   ;;  %vm578_vm5 = vcmask 138240   ;;  %s310_s14 = sand.u32 1, %s1173_s22  }
  0x1c   : > { %s999_s19 = sshll.u32 %s315_s18, 3  ;;  %s1000_s13 = sshll.u32 %s315_s18, 4  ;;  %v585_v34 = vld [vmem:[%s1404_s4] sm:$0xff] }
  0x1d   : > { %s321_s28 = scalar_lea.vmem %s1400_s0, %s999_s19  ;;  %s331_s16 = scalar_lea.vmem %s1401_s1, %s1000_s13  ;;  %v816_v37 = vld [vmem:[%s1405_s5] sm:$0xff] }
  0x1e   : > { %v334_v0 = vld [vmem:[%s321_s28] sm:$0xff]  ;;  %v598_v8 = vld [vmem:[%s331_s16 + $0x8] sm:$0xff]  ;;  %s1196_s28 = smov 16   ;;  %s962_s15 = sshll.u32 %s310_s14, 5 }
  0x1f   : > { %339 = vst [vmem:[#allocation1] ss:$2 sm:$0xff] %v334_v0  ;;  %v597_v9 = vld [vmem:[%s331_s16] sm:$0xff]  ;;  %s312_s16 = scalar_lea.vmem [#allocation5], %s962_s15  ;;  %s1001_s17 = sshll.u32 %s1181_s24, 5 }
  0x20   : > { %s842_s20 = scalar_lea.hbm %s1406_s6, %s1001_s17  ;;  %s1127_s15 = scalar_lea.hbm %s1406_s6, 64 }
  0x21   : > { %s845_s24 = sshll.u32 %s842_s20, 4  ;;  %s846_s24 = int_to_ptr.hbm [resolvable:$true] %s845_s24 }
  0x22   : > { %s1121_s8 = sshra.s32 %s846_s24, 4  ;;  %s1122_s8 = int_to_ptr.hbm [resolvable:$true] %s1121_s8 }
  0x23   : > { %s1123_s11 = scalar_lea.hbm %s1122_s8, 32  ;;  %p1128_p5 = scmp.lt.s32.totalorder %s1122_s8, %s1406_s6 }
  0x24   : > { %p1124_p1 = scmp.ne.s32.totalorder %s1122_s8, %s1123_s11  ;;  %p1129_p6 = scmp.lt.s32.totalorder %s1127_s15, %s1123_s11 }
  0x26   : > { %v341_v2 = vld.sshfl [vmem:[#allocation1 + $0x8] sm:$0xff pattern:$0x75316420]  ;;  %v340_v3 = vld.sshfl [vmem:[#allocation1] sm:$0xff pattern:$0x75316420]  ;;  %p1125_p2 = pnand %p1124_p1, %p1274_p4  ;;  %p1130_p7 = por %p1129_p6, %p1128_p5 }
  0x27   : > { %970 = vmatpush.msk.msra.mxu1 %vm346_vm0, %v341_v2  ;;  %968 = vmatpush.msk.msra.mxu0 %vm346_vm0, %v340_v3  ;;  %403 = vst [vmem:[#allocation1] ss:$2 sm:$0xff] %v334_v0 }
  0x28   : > { %971 = vmatmul.msk.f32.vlgmr.msra.gmra.mxu1 %vm342_vm1, %v967_v1  ;;  %969 = vmatmul.msk.f32.vlgmr.msra.gmra.mxu0 %vm342_vm1, %v967_v1  ;;  %p1126_p3 = pneg %p1125_p2 }
  0x2a   : > { %p1131_p9 = pnand %p1130_p7, %p1126_p3 }
  0x2e   : > { %v404_v5 = vld.sshfl [vmem:[#allocation1] sm:$0xff pattern:$0x75316420]  ;;  %v405_v6 = vld.sshfl [vmem:[#allocation1 + $0x8] sm:$0xff pattern:$0x75316420] }
  0x2f   : > { %972 = vmatpush.msk.msra.mxu2 %vm346_vm0, %v404_v5  ;;  %455 = vst [vmem:[#allocation1] ss:$2 sm:$0xff] %v334_v0  ;;  %974 = vmatpush.msk.msra.mxu3 %vm346_vm0, %v405_v6 }
  0x30   : > { %973 = vmatmul.msk.f32.vlgmr.msra.gmra.mxu2 %vm342_vm1, %v335_v4  ;;  %975 = vmatmul.msk.f32.vlgmr.msra.gmra.mxu3 %vm342_vm1, %v335_v4 }
  0x36   : > { %v457_v10 = vld.sshfl [vmem:[#allocation1 + $0x8] sm:$0xff pattern:$0x75316420]  ;;  %v456_v11 = vld.sshfl [vmem:[#allocation1] sm:$0xff pattern:$0x75316420] }
  0x37   : > { %979 = vmatpush.msk.msrb.mxu1 %vm346_vm0, %v457_v10  ;;  %977 = vmatpush.msk.msrb.mxu0 %vm346_vm0, %v456_v11  ;;  %521 = vst [vmem:[#allocation1] ss:$2 sm:$0xff] %v334_v0 }
  0x38   : > { %980 = vmatmul.msk.f32.vlgmr.msrb.gmra.mxu1 %vm342_vm1, %v976_v7  ;;  %978 = vmatmul.msk.f32.vlgmr.msrb.gmra.mxu0 %vm342_vm1, %v976_v7 }
  0x39   : > { %641 = vmatpush.msra.mxu1 %v598_v8  ;;  %621 = vmatpush.msra.mxu0 %v597_v9 }
  0x3b   : > { %740 = vmatpush.msrb.mxu1 %v598_v8  ;;  %720 = vmatpush.msrb.mxu0 %v597_v9 }
  0x3e   : > { %v522_v14 = vld.sshfl [vmem:[#allocation1] sm:$0xff pattern:$0x75316420]  ;;  %v523_v15 = vld.sshfl [vmem:[#allocation1 + $0x8] sm:$0xff pattern:$0x75316420] }
  0x3f   : > { %982 = vmatpush.msk.msrb.mxu2 %vm346_vm0, %v522_v14  ;;  %984 = vmatpush.msk.msrb.mxu3 %vm346_vm0, %v523_v15 }
  0x40   : > { %983 = vmatmul.msk.f32.vlgmr.msrb.gmra.mxu2 %vm342_vm1, %v981_v12  ;;  %987 = vmatmul.msk.f32.vlgmr.msra.gmra.mxu1 %vm602_vm2, %v601_v13 }
  0x41   : > { %985 = vmatmul.msk.f32.vlgmr.msrb.gmra.mxu3 %vm342_vm1, %v981_v12  ;;  %986 = vmatmul.msk.f32.vlgmr.msra.gmra.mxu0 %vm602_vm2, %v601_v13 }
  0x42   : > { %695 = vmatpush.msra.mxu3 %v598_v8  ;;  %675 = vmatpush.msra.mxu2 %v597_v9 }
  0x44   : > { %798 = vmatpush.msrb.mxu3 %v598_v8  ;;  %778 = vmatpush.msrb.mxu2 %v597_v9 }
  0x48   : > { %991 = vmatmul.msk.f32.vlgmr.msrb.gmra.mxu1 %vm602_vm2, %v701_v16  ;;  %988 = vmatmul.msk.f32.vlgmr.msra.gmra.mxu2 %vm602_vm2, %v599_v17 }
  0x49   : > { %989 = vmatmul.msk.f32.vlgmr.msra.gmra.mxu3 %vm602_vm2, %v599_v17  ;;  %990 = vmatmul.msk.f32.vlgmr.msrb.gmra.mxu0 %vm602_vm2, %v701_v16 }
  0x50   : > { %992 = vmatmul.msk.f32.vlgmr.msrb.gmra.mxu2 %vm602_vm2, %v759_v18 }
  0x51   : > { %993 = vmatmul.msk.f32.vlgmr.msrb.gmra.mxu3 %vm602_vm2, %v759_v18 }
  0xa5   : > { %v388_v19 = vpop.f32.mrf.mxu1  ;;  %v368_v20 = vpop.f32.mrf.mxu0 }
  0xa6   : > { %392 = vrot.lane.b32.xlu0 %v388_v19, %s1194_s27 }
  0xae   : > { %396 = vrot.lane.b32.xlu0 %v368_v20, %s1194_s27 }
  0xb3   : > { %v430_v24 = vpop.f32.mrf.mxu2  ;;  %v450_v25 = vpop.f32.mrf.mxu3 }
  0xb5   : > { %v502_v22 = vpop.f32.mrf.mxu1  ;;  %v482_v23 = vpop.f32.mrf.mxu0 }
  0xb6   : > { %506 = vrot.lane.b32.xlu2 %v502_v22, %s1196_s28 }
  0xbd   : > { %v643_v26 = vpop.f32.mrf.mxu1 }
  0xbe   : > { %647 = vrot.lane.b32.xlu1 %v643_v26, %s1194_s27  ;;  %510 = vrot.lane.b32.xlu2 %v482_v23, %s1196_s28  ;;  %v623_v27 = vpop.f32.mrf.mxu0 }
  0xc3   : > { %v548_v28 = vpop.f32.mrf.mxu2 }
  0xc4   : > { %576 = vrot.lane.b32.xlu0 %v548_v28, %s1197_s30  ;;  %v568_v29 = vpop.f32.mrf.mxu3 }
  0xc5   : > { %v742_v30 = vpop.f32.mrf.mxu1 }
  0xc6   : > { %651 = vrot.lane.b32.xlu1 %v623_v27, %s1194_s27  ;;  %572 = vrot.lane.b32.xlu2 %v568_v29, %s1197_s30  ;;  %v722_v31 = vpop.f32.mrf.mxu0  ;;  %s843_s27 = sshll.u32 %s312_s16, 4  ;;  %s844_s27 = int_to_ptr.vmem [resolvable:$true] %s843_s27 }
  0xcb   : > { %v677_v32 = vpop.f32.mrf.mxu2 }
  0xcc   : > { %746 = vrot.lane.b32.xlu0 %v742_v30, %s1196_s28  ;;  %v697_v33 = vpop.f32.mrf.mxu3 }
  0xce   : > { %750 = vrot.lane.b32.xlu1 %v722_v31, %s1196_s28 }
  0xd3   : > { %v780_v35 = vpop.f32.mrf.mxu2 }
  0xd4   : > { %588 = vperm.xlu0 %1075, %v585_v34   ;;  %v800_v36 = vpop.f32.mrf.mxu3  ;;  %808 = vrot.lane.b32.xlu2 %v780_v35, %s1197_s30 }
  0xd6   : > { %804 = vrot.lane.b32.xlu1 %v800_v36, %s1197_s30  ;;  %s829_s30 = scalar_lea.sflag [#allocation4], %s310_s14 }
  0xde   : > { %819 = vperm.xlu1 %1076, %v816_v37  }
 0x110   : > { %v507_v39 = vpop.permute.xlu2 %506 }
 0x118   : > { %v393_v38 = vpop.permute.xlu0 %392  ;;  %v511_v43 = vpop.permute.xlu2 %510 }
 0x119   : > { %v513_v52 = vsel %vm512_vm4, %v511_v43, %v507_v39  ;;  %v516_v53 = vsel %vm512_vm4, %v507_v39, %v511_v43 }
 0x120   : > { %v397_v40 = vpop.permute.xlu0 %396  ;;  %v573_v51 = vpop.permute.xlu2 %572 }
 0x121   : > { %v399_v45 = vsel %vm398_vm3, %v397_v40, %v393_v38  ;;  %v402_v46 = vsel %vm398_vm3, %v393_v38, %v397_v40 }
 0x122   : > { %v431_v48 = vadd.f32 %v430_v24, %v402_v46  ;;  %v451_v49 = vadd.f32 %v450_v25, %v399_v45 }
 0x124   : > { %v517_v56 = vadd.f32 %v516_v53, %v431_v48  ;;  %v518_v57 = vadd.f32 %v513_v52, %v451_v49 }
 0x12e   : > { %v809_v4 = vpop.permute.xlu2 %808 }
 0x130   : > { %v648_v41 = vpop.permute.xlu1 %647 }
 0x136   : > { %v577_v42 = vpop.permute.xlu0 %576 }
 0x137   : > { %v579_v54 = vsel %vm578_vm5, %v577_v42, %v573_v51  ;;  %v582_v55 = vsel %vm578_vm5, %v573_v51, %v577_v42 }
 0x138   : > { %v652_v44 = vpop.permute.xlu1 %651  ;;  %v583_v58 = vadd.f32 %v582_v55, %v517_v56  ;;  %v584_v59 = vadd.f32 %v579_v54, %v518_v57 }
 0x139   : > { %v653_v63 = vsel %vm398_vm3, %v652_v44, %v648_v41  ;;  %v656_v0 = vsel %vm398_vm3, %v648_v41, %v652_v44 }
 0x13a   : > { %v678_v7 = vadd.f32 %v677_v32, %v656_v0  ;;  %v698_v8 = vadd.f32 %v697_v33, %v653_v63 }
 0x13e   : > { %v747_v47 = vpop.permute.xlu0 %746 }
 0x140   : > { %v751_v50 = vpop.permute.xlu1 %750 }
 0x141   : > { %v752_v5 = vsel %vm512_vm4, %v751_v50, %v747_v47  ;;  %v755_v6 = vsel %vm512_vm4, %v747_v47, %v751_v50 }
 0x142   : > { %v756_v11 = vadd.f32 %v755_v6, %v678_v7  ;;  %v757_v12 = vadd.f32 %v752_v5, %v698_v8 }
 0x146   : > { %v589_v60 = vpop.permute.xlu0 %588 }
 0x147   : > { %v591_v61 = vadd.f32 %v589_v60, %v583_v58  ;;  %v592_v62 = vadd.f32 %v589_v60, %v584_v59 }
 0x148   : > { %v805_v1 = vpop.permute.xlu1 %804 }
 0x149   : > { %v593_v2 = vmax.f32 %v591_v61, 0.0  ;;  %v594_v3 = vmax.f32 %v592_v62, 0.0  ;;  %v810_v9 = vsel %vm578_vm5, %v809_v4, %v805_v1  ;;  %v813_v10 = vsel %vm578_vm5, %v805_v1, %v809_v4 }
 0x14a   : > { %v814_v13 = vadd.f32 %v813_v10, %v756_v11  ;;  %v815_v14 = vadd.f32 %v810_v9, %v757_v12 }
 0x14b   : > { %595 = vst [vmem:[%s312_s16] sm:$0xff] %v593_v2 }
 0x14c   : > { %596 = vst [vmem:[%s312_s16 + $0x8] sm:$0xff] %v594_v3 }
 0x150   : > { %v820_v15 = vpop.permute.xlu1 %819 }
 0x151   : > { %v822_v16 = vadd.f32 %v820_v15, %v814_v13  ;;  %v823_v17 = vadd.f32 %v820_v15, %v815_v14 }
 0x153   : > { %v824_v18 = vmax.f32 %v822_v16, 0.0  ;;  %v825_v19 = vmax.f32 %v823_v17, 0.0 }
 0x155   : > { %826 = vst [vmem:[%s312_s16 + $0x10] sm:$0xff] %v824_v18 }
 0x156   : > { %827 = vst [vmem:[%s312_s16 + $0x18] sm:$0xff] %v825_v19 }
 0x157   : > { %1134 = shalt.err (!%p1131_p9)
}
 0x158   : > { %s1198_s14 = smov 256  }
 0x159   : > { %1006 = dma.vmem_to_hbm [thread:$0]  (%p1274_p4), %s844_s27, 512, %s846_s24, %s829_s30, %s1198_s14, %s1198_s14, %s1196_s28  }
 0x15a PF: > { %p1018_p10 = scmp.ge.s32.totalorder %s1189_s26, 2  ;;  %s860_s16 = sand.u32 1, %s1169_s21  }
 0x15b   : > { %s861_s18 = scalar_lea.sflag [#allocation4], %s860_s16 }
 0x15c   : > { %p1013_p11 = pnand %p1018_p10, %p1281_p8 }
 0x15e   : > { %p1014_p12 = pneg %p1013_p11 }
 0x160   : > { %1164 = dma.done.wait (%p1014_p12), %s861_s18, 512  }
 0x161   : > { %1166 = vsyncadd (%p1014_p12), %s861_s18, 4294966784  ;;  %s20_s26 = sadd.s32 1, %s1189_s26   ;;  %s1409_s21 = smov %s1173_s22 }
 0x162   : > { %p17_p13 = scmp.ge.s32.totalorder %s20_s26, 4   ;;  %s1410_s22 = smov %s1177_s23 }
 0x163   : > { %s1411_s23 = smov %s1287_s10  ;;  %s1412_s24 = smov %s1185_s25 }
 0x164   : > { %s1413_s25 = smov %s1415_s29  ;;  %19 = sbr.rel (!%p17_p13) target bundleno = 5 (0x5), region = 93 }
 0x169   :  { %867 = vsyncpa [#allocation3], 1 }
 0x16a   :  { %869 = vsyncpa [#allocation3 + $0x1], 1 }
 0x16b   :  { %870 = vsyncpa [#allocation4], 1 }
 0x16c   :  { %872 = vsyncpa [#allocation4 + $0x1], 1 }

</bundles_post_ra>
